<compile_context>
chip_gen: v7x
topology: tpu7x:2x2x1
jax: 0.10.0
libtpu: 0.0.40
codegen_flags: <defaults>
</compile_context>

<pallas_src>
import jax
import jax.numpy as jnp
from jax.experimental import pallas as pl
from jax.experimental.pallas import tpu as pltpu  # noqa: F401  (TPU backend assumed)

# Synthetic environment sizes (CartPole-like): N_STATES=4, N_ACTIONS=2
N_STATES = 4
N_ACTIONS = 2
HIDDEN = 128          # fc1 width (nn.Linear(N_STATES, 128))
OUT_PAD = 128         # lane-dense output width; real Q-values live in lanes [0, N_ACTIONS)

# Packed operand geometry (sublane dim padded to a multiple of 8).
W1_ROWS = ((N_STATES + 1 + 7) // 8) * 8   # 8  : rows 0..3 = W1^T, row 4 = b1, rest 0
W2_ROWS = HIDDEN + 8                      # 136: rows 0..127 = W2^T (cols padded), row 128 = b2


def net_kernel(x_ref, w1_ref, w2_ref, o_ref):
    b = x_ref.shape[0]
    x = x_ref[...]                                   # [B, N_STATES] f32
    w1 = w1_ref[...]                                 # [W1_ROWS, HIDDEN]

    # fc1 + bias as a VPU broadcast-FMA chain, seeded with the folded b1 row.
    h = jnp.broadcast_to(w1[N_STATES:N_STATES + 1, :], (b, HIDDEN))
    for k in range(N_STATES):                        # static unroll: 4 broadcast-FMAs
        h = h + x[:, k:k + 1] * w1[k:k + 1, :]
    h = jnp.maximum(h, 0.0)                          # ReLU

    # fc2 on the MXU with N padded to 128 -> lane-dense result; add the folded b2 row.
    w2 = w2_ref[0:HIDDEN, :]                         # [HIDDEN, OUT_PAD]
    b2 = w2_ref[HIDDEN:HIDDEN + 1, :]                # [1, OUT_PAD]
    out = jnp.dot(h, w2, preferred_element_type=jnp.float32) + b2
    o_ref[...] = out.astype(o_ref.dtype)             # [B, OUT_PAD] full-vreg store


def pack_params(w1_t, b1, w2_t, b2):
    """Fold biases into the weight operands (done once, outside the kernel).

    w1_t: [N_STATES, HIDDEN], b1: [HIDDEN] or [1, HIDDEN]
    w2_t: [HIDDEN, N_ACTIONS], b2: [N_ACTIONS] or [1, N_ACTIONS]
    """
    w1_aug = jnp.zeros((W1_ROWS, HIDDEN), jnp.float32)
    w1_aug = w1_aug.at[:N_STATES, :].set(w1_t)
    w1_aug = w1_aug.at[N_STATES, :].set(jnp.reshape(b1, (-1,)))

    w2_aug = jnp.zeros((W2_ROWS, OUT_PAD), jnp.float32)
    w2_aug = w2_aug.at[:HIDDEN, :N_ACTIONS].set(w2_t)
    w2_aug = w2_aug.at[HIDDEN, :N_ACTIONS].set(jnp.reshape(b2, (-1,)))
    return w1_aug, w2_aug


@jax.jit
def net_forward(x, w1_aug, w2_aug):
    """x: [B, N_STATES] f32; w1_aug: [W1_ROWS, HIDDEN]; w2_aug: [W2_ROWS, OUT_PAD]."""
    B = x.shape[0]
    full = lambda shape: pl.BlockSpec(shape, lambda: (0,) * len(shape))
    bytes_accessed = 4 * (x.size + w1_aug.size + w2_aug.size + B * OUT_PAD)
    out_pad = pl.pallas_call(
        net_kernel,
        out_shape=jax.ShapeDtypeStruct((B, OUT_PAD), jnp.float32),
        in_specs=[full(x.shape), full(w1_aug.shape), full(w2_aug.shape)],
        out_specs=full((B, OUT_PAD)),
        cost_estimate=pl.CostEstimate(
            flops=2 * B * (N_STATES * HIDDEN + HIDDEN * N_ACTIONS),
            transcendentals=0,
            bytes_accessed=bytes_accessed,
        ),
    )(x, w1_aug, w2_aug)
    return out_pad[:, :N_ACTIONS]          # slice the lane-dense slab in the wrapper


def init_params(key):
    """Deterministic init mimicking PyTorch nn.Linear default (uniform +/- 1/sqrt(fan_in))."""
    k1, k2, k3, k4 = jax.random.split(key, 4)
    bound1 = 1.0 / jnp.sqrt(jnp.float32(N_STATES))
    bound2 = 1.0 / jnp.sqrt(jnp.float32(HIDDEN))
    # Stored transposed relative to PyTorch's [out, in] convention.
    w1_t = jax.random.uniform(k1, (N_STATES, HIDDEN), jnp.float32, -bound1, bound1)
    b1 = jax.random.uniform(k2, (HIDDEN,), jnp.float32, -bound1, bound1)
    w2_t = jax.random.uniform(k3, (HIDDEN, N_ACTIONS), jnp.float32, -bound2, bound2)
    b2 = jax.random.uniform(k4, (N_ACTIONS,), jnp.float32, -bound2, bound2)
    return w1_t, b1, w2_t, b2


def reference_forward(x, w1_t, b1, w2_t, b2):
    h = jnp.maximum(x @ w1_t + b1[None, :], 0.0)
    return h @ w2_t + b2[None, :]


if __name__ == "__main__":
    key = jax.random.PRNGKey(0)
    kx, kp = jax.random.split(key)

    batch = 8  # multiple of the 8-sublane tile; keeps every vreg fully dense
    x = jax.random.normal(kx, (batch, N_STATES), jnp.float32)
    w1_t, b1, w2_t, b2 = init_params(kp)
    w1_aug, w2_aug = pack_params(w1_t, b1, w2_t, b2)

    actions_prob = net_forward(x, w1_aug, w2_aug)
    actions_prob = jax.block_until_ready(actions_prob)

    # Sanity check against a pure-JAX reference of the original PyTorch forward.
    ref = reference_forward(x, w1_t, b1, w2_t, b2)
    assert actions_prob.shape == (batch, N_ACTIONS)
    assert jnp.allclose(actions_prob, ref, atol=1e-5, rtol=1e-5)

    print("KERNEL_OK")
</pallas_src>

<mosaic_0001>
module attributes {stable_mosaic.version = 11 : i64} {
  func.func @net_kernel(%arg0: memref<8x4xf32, #tpu.memory_space<vmem>>, %arg1: memref<8x128xf32, #tpu.memory_space<vmem>>, %arg2: memref<136x128xf32, #tpu.memory_space<vmem>>, %arg3: memref<8x128xf32, #tpu.memory_space<vmem>>) attributes {dimension_semantics = [], scalar_prefetch = 0 : i64, scratch_operands = 0 : i64, tpu.core_type = #tpu.core_type<tc>} {
    %c0 = arith.constant 0 : index
    %c0_0 = arith.constant 0 : index
    %0 = vector.load %arg0[%c0, %c0_0] : memref<8x4xf32, #tpu.memory_space<vmem>>, vector<8x4xf32>
    %c0_1 = arith.constant 0 : index
    %c0_2 = arith.constant 0 : index
    %1 = vector.load %arg1[%c0_1, %c0_2] : memref<8x128xf32, #tpu.memory_space<vmem>>, vector<8x128xf32>
    %2 = vector.extract_strided_slice %1 {offsets = [4, 0], sizes = [1, 128], strides = [1, 1]} : vector<8x128xf32> to vector<1x128xf32>
    %3 = vector.shape_cast %2 : vector<1x128xf32> to vector<1x128xf32>
    %4 = vector.broadcast %3 : vector<1x128xf32> to vector<8x128xf32>
    %5 = vector.extract_strided_slice %0 {offsets = [0, 0], sizes = [8, 1], strides = [1, 1]} : vector<8x4xf32> to vector<8x1xf32>
    %6 = vector.extract_strided_slice %1 {offsets = [0, 0], sizes = [1, 128], strides = [1, 1]} : vector<8x128xf32> to vector<1x128xf32>
    %7 = vector.broadcast %5 : vector<8x1xf32> to vector<8x128xf32>
    %8 = vector.broadcast %6 : vector<1x128xf32> to vector<8x128xf32>
    %9 = arith.mulf %7, %8 : vector<8x128xf32>
    %10 = arith.addf %4, %9 : vector<8x128xf32>
    %11 = vector.extract_strided_slice %0 {offsets = [0, 1], sizes = [8, 1], strides = [1, 1]} : vector<8x4xf32> to vector<8x1xf32>
    %12 = vector.extract_strided_slice %1 {offsets = [1, 0], sizes = [1, 128], strides = [1, 1]} : vector<8x128xf32> to vector<1x128xf32>
    %13 = vector.broadcast %11 : vector<8x1xf32> to vector<8x128xf32>
    %14 = vector.broadcast %12 : vector<1x128xf32> to vector<8x128xf32>
    %15 = arith.mulf %13, %14 : vector<8x128xf32>
    %16 = arith.addf %10, %15 : vector<8x128xf32>
    %17 = vector.extract_strided_slice %0 {offsets = [0, 2], sizes = [8, 1], strides = [1, 1]} : vector<8x4xf32> to vector<8x1xf32>
    %18 = vector.extract_strided_slice %1 {offsets = [2, 0], sizes = [1, 128], strides = [1, 1]} : vector<8x128xf32> to vector<1x128xf32>
    %19 = vector.broadcast %17 : vector<8x1xf32> to vector<8x128xf32>
    %20 = vector.broadcast %18 : vector<1x128xf32> to vector<8x128xf32>
    %21 = arith.mulf %19, %20 : vector<8x128xf32>
    %22 = arith.addf %16, %21 : vector<8x128xf32>
    %23 = vector.extract_strided_slice %0 {offsets = [0, 3], sizes = [8, 1], strides = [1, 1]} : vector<8x4xf32> to vector<8x1xf32>
    %24 = vector.extract_strided_slice %1 {offsets = [3, 0], sizes = [1, 128], strides = [1, 1]} : vector<8x128xf32> to vector<1x128xf32>
    %25 = vector.broadcast %23 : vector<8x1xf32> to vector<8x128xf32>
    %26 = vector.broadcast %24 : vector<1x128xf32> to vector<8x128xf32>
    %27 = arith.mulf %25, %26 : vector<8x128xf32>
    %28 = arith.addf %22, %27 : vector<8x128xf32>
    %cst = arith.constant 0.000000e+00 : f32
    %29 = vector.broadcast %cst : f32 to vector<8x128xf32>
    %30 = arith.maximumf %28, %29 : vector<8x128xf32>
    %c0_3 = arith.constant 0 : index
    %c0_4 = arith.constant 0 : index
    %31 = vector.load %arg2[%c0_3, %c0_4] : memref<136x128xf32, #tpu.memory_space<vmem>>, vector<128x128xf32>
    %c128 = arith.constant 128 : index
    %c0_5 = arith.constant 0 : index
    %32 = vector.load %arg2[%c128, %c0_5] : memref<136x128xf32, #tpu.memory_space<vmem>>, vector<1x128xf32>
    %cst_6 = arith.constant dense<0.000000e+00> : vector<8x128xf32>
    %33 = tpu.matmul %30, %31, %cst_6 {dimension_numbers = #tpu.dot_dimension_numbers<[1], [0], [0], [1], [0, 0, 1, 1], [], []>} : vector<8x128xf32>, vector<128x128xf32>, vector<8x128xf32> -> vector<8x128xf32>
    %34 = vector.broadcast %32 : vector<1x128xf32> to vector<8x128xf32>
    %35 = arith.addf %33, %34 : vector<8x128xf32>
    %c0_7 = arith.constant 0 : index
    %c0_8 = arith.constant 0 : index
    %36 = vector.load %arg3[%c0_7, %c0_8] : memref<8x128xf32, #tpu.memory_space<vmem>>, vector<8x128xf32>
    tpu.vector_store %arg3[%c0_7, %c0_8], %35 {strides = array<i32>} : memref<8x128xf32, #tpu.memory_space<vmem>>, vector<8x128xf32>,
    return
  }
}

</mosaic_0001>

<bundles_post_ra>
// kernel: net_forward.1
= control target key start
LH: loop header
LB: loop body
LE: loop exit
PB: predicated region body
PF: predicated region fallthrough
CT: control target
= control target key end

     0   :  { %8 = vsyncpa [#allocation3], 0  ;;  %s289_s12 = smov [#allocation2]   ;;  %s340_s0 = inlined_call_operand.vmem [shape: f32[8,4], index: 0, kind: input, shape index: {}]   ;;  %s341_s1 = inlined_call_operand.vmem [shape: f32[8,128], index: 1, kind: input, shape index: {}]   ;;  %s342_s2 = inlined_call_operand.hbm [shape: f32[136,128], index: 2, kind: input, shape index: {}]   ;;  %s343_s3 = inlined_call_operand.vmem [shape: f32[8,128], index: 3, kind: output, shape index: {}]  }
   0x1   :  { %s18_s13 = sshll.u32 %s289_s12, 4  ;;  %s265_s16 = scalar_lea.hbm %s342_s2, 2176  ;;  %s19_s13 = int_to_ptr.vmem [resolvable:$true] %s18_s13 }
   0x2   :  { %p266_p0 = scmp.ne.s32.totalorder %s342_s2, %s265_s16  ;;  %p269_p1 = scmp.lt.u32.totalorder %s265_s16, %s342_s2 }
   0x4   :  { %p271_p2 = pnand %p269_p1, %p266_p0 }
   0x6   :  { %274 = shalt.err (!%p271_p2)
}
   0x7   :  { %s275_s21 = scalar_lea.vmem %s19_s13, 2176  ;;  %p280_p4 = scmp.lt.s32.totalorder %s19_s13, %s19_s13 }
   0x8   :  { %p276_p3 = scmp.ne.s32.totalorder %s19_s13, %s275_s21  ;;  %p281_p5 = scmp.lt.s32.totalorder %s275_s21, %s275_s21 }
   0xa   :  { %p282_p6 = por %p281_p5, %p280_p4 }
   0xc   :  { %p283_p7 = pnand %p282_p6, %p276_p3 }
   0xe   :  { %286 = shalt.err (!%p283_p7)
}
   0xf   :  { %s290_s22 = smov 128   ;;  %s291_s23 = smov 8  }
  0x10   :  { %24 = dma.hbm_to_vmem [thread:$0]  %s342_s2, 2176, %s19_s13, [#allocation3], %s290_s22, %s290_s22, %s291_s23  }
  0x11   :  { %287 = dma.done.wait [#allocation3], 2176  }
  0x12   :  { %288 = vsyncadd [#allocation3], 4294965120  ;;  %v292_v0 = vmov 0   ;;  %v293_v1 = vmov 2   ;;  %v294_v2 = vmov 0.0|0.0   ;;  %v28_v3 = vld [vmem:[%s340_s0] sm:$0xff]  ;;  %v30_v31 = vlaneseq }
  0x13   :  { %260 = vset.pattern.permute.xlu0 %v292_v0  ;;  %262 = vset.pattern.permute.xlu1 %v293_v1  ;;  %v76_v4 = vld [vmem:[#allocation2] sm:$0xff]  ;;  %v77_v5 = vld [vmem:[#allocation2 + $0x8] sm:$0xff]  ;;  %v78_v7 = vld [vmem:[#allocation2 + $0x10] sm:$0xff]  ;;  %v295_v12 = vmov 1   ;;  %v296_v13 = vmov 3   ;;  %vm297_vm0 = vmmov 0  }
  0x14   :  { %226 = vmatprep.subr.bf16.mxu0 %v294_v2  ;;  %36 = vperm.xlu0 %260, %v28_v3   ;;  %v227_v6 = vpack.c.bf16 %v77_v5, %v76_v4  ;;  %v79_v8 = vld [vmem:[#allocation2 + $0x18] sm:$0xff]  ;;  %v80_v10 = vld [vmem:[#allocation2 + $0x20] sm:$0xff]  ;;  %v81_v11 = vld [vmem:[#allocation2 + $0x28] sm:$0xff]  ;;  %v298_v21 = vmov 0.0   ;;  %v31_v32 = vshrl.u32 %v30_v31, 7 }
  0x15   :  { %56 = vperm.xlu1 %262, %v28_v3   ;;  %v230_v9 = vpack.c.bf16 %v79_v8, %v78_v7  ;;  %v233_v14 = vpack.c.bf16 %v81_v11, %v80_v10  ;;  %v82_v15 = vld [vmem:[#allocation2 + $0x30] sm:$0xff]  ;;  %v83_v16 = vld [vmem:[#allocation2 + $0x38] sm:$0xff]  ;;  %v84_v18 = vld [vmem:[#allocation2 + $0x40] sm:$0xff]  ;;  %223 = vmatprep.mubr.msk.f32.mxu0 %vm297_vm0, %v298_v21 }
  0x16   :  { %228 = vmatpush3.bf16.msra.mxu0 %v227_v6  ;;  %v236_v17 = vpack.c.bf16 %v83_v16, %v82_v15  ;;  %v85_v19 = vld [vmem:[#allocation2 + $0x48] sm:$0xff]  ;;  %v86_v22 = vld [vmem:[#allocation2 + $0x50] sm:$0xff]  ;;  %v87_v23 = vld [vmem:[#allocation2 + $0x58] sm:$0xff]  ;;  %v41_v33 = vsub.s32 0, %v31_v32  ;;  %v32_v35 = vsub.s32 4, %v31_v32  ;;  %v51_v37 = vsub.s32 1, %v31_v32 }
  0x17   :  { %229 = vmatprep.subr.bf16.mxu0 %v294_v2  ;;  %v239_v20 = vpack.c.bf16 %v85_v19, %v84_v18  ;;  %v242_v24 = vpack.c.bf16 %v87_v23, %v86_v22  ;;  %v88_v25 = vld [vmem:[#allocation2 + $0x60] sm:$0xff]  ;;  %v89_v26 = vld [vmem:[#allocation2 + $0x68] sm:$0xff]  ;;  %v90_v28 = vld [vmem:[#allocation2 + $0x70] sm:$0xff]  ;;  %v61_v39 = vsub.s32 2, %v31_v32  ;;  %v71_v41 = vsub.s32 3, %v31_v32 }
  0x18   :  { %261 = vset.pattern.permute.xlu0 %v295_v12  ;;  %v245_v27 = vpack.c.bf16 %v89_v26, %v88_v25  ;;  %v91_v29 = vld [vmem:[#allocation2 + $0x78] sm:$0xff]  ;;  %v29_v34 = vld [vmem:[%s341_s1] sm:$0xff] }
  0x19   :  { %263 = vset.pattern.permute.xlu1 %v296_v13  ;;  %46 = vperm.xlu0 %261, %v28_v3   ;;  %v248_v30 = vpack.c.bf16 %v91_v29, %v90_v28  ;;  %v42_v36 = vrot.slane %v29_v34, %v41_v33  ;;  %v33_v42 = vrot.slane %v29_v34, %v32_v35  ;;  %v173_v57 = vld [vmem:[#allocation2 + $0x80] ss:$0 sm:$0xff] }
  0x1a   :  { %66 = vperm.xlu1 %263, %v28_v3   ;;  %231 = vmatpush3.bf16.msra.mxu0 %v230_v9  ;;  %v52_v44 = vrot.slane %v29_v34, %v51_v37  ;;  %v62_v45 = vrot.slane %v29_v34, %v61_v39  ;;  %v72_v46 = vrot.slane %v29_v34, %v71_v41 }
  0x1b   :  { %232 = vmatprep.subr.bf16.mxu0 %v294_v2 }
  0x1d   :  { %264 = vset.pattern.permute.xlu0 %v296_v13 }
  0x1e   :  { %234 = vmatpush3.bf16.msra.mxu0 %v233_v14 }
  0x1f   :  { %235 = vmatprep.subr.bf16.mxu0 %v294_v2 }
  0x22   :  { %237 = vmatpush3.bf16.msra.mxu0 %v236_v17 }
  0x23   :  { %238 = vmatprep.subr.bf16.mxu0 %v294_v2 }
  0x26   :  { %240 = vmatpush3.bf16.msra.mxu0 %v239_v20 }
  0x27   :  { %241 = vmatprep.subr.bf16.mxu0 %v294_v2 }
  0x2a   :  { %243 = vmatpush3.bf16.msra.mxu0 %v242_v24 }
  0x2b   :  { %244 = vmatprep.subr.bf16.mxu0 %v294_v2 }
  0x2e   :  { %246 = vmatpush3.bf16.msra.mxu0 %v245_v27 }
  0x2f   :  { %247 = vmatprep.subr.bf16.mxu0 %v294_v2 }
  0x32   :  { %249 = vmatpush3.bf16.msra.mxu0 %v248_v30 }
  0x93   :  { %v37_v38 = vpop.permute.xlu0 %36 }
  0x94   :  { %v57_v40 = vpop.permute.xlu1 %56  ;;  %v43_v43 = vmul.f32 %v42_v36, %v37_v38 }
  0x95   :  { %v63_v51 = vmul.f32 %v62_v45, %v57_v40 }
  0x96   :  { %v44_v49 = vadd.f32 %v43_v43, %v33_v42 }
  0x98   :  { %v47_v47 = vpop.permute.xlu0 %46 }
  0x99   :  { %v67_v48 = vpop.permute.xlu1 %66  ;;  %v53_v50 = vmul.f32 %v52_v44, %v47_v47 }
  0x9a   :  { %v73_v53 = vmul.f32 %v72_v46, %v67_v48 }
  0x9b   :  { %v54_v52 = vadd.f32 %v53_v50, %v44_v49 }
  0x9d   :  { %v64_v54 = vadd.f32 %v63_v51, %v54_v52 }
  0x9f   :  { %v74_v55 = vadd.f32 %v73_v53, %v64_v54 }
  0xa1   :  { %v75_v56 = vmax.f32 %v74_v55, 0.0 }
  0xa3   :  { %224 = vmatmul.mubr.f32.vlgmr.msra.gmra.mrb[0].mxu0 %v75_v56 }
 0x176   :  { %v163_v58 = vpop.f32.mrb[0].mxu0 }
 0x177   :  { %v164_v59 = vadd.f32 %v173_v57, %v163_v58  ;;  %v225_v60 = vpop.f32.mrb[1].mxu0 }
 0x179   :  { %167 = vst [vmem:[%s343_s3] sm:$0xff] %v164_v59 }
 0x17a   :  { %172 = vsyncpa [#allocation3], 1 }

</bundles_post_ra>
